<compile_context>
chip_gen: v5e
topology: v5e:2x2
jax: 0.10.0
libtpu: 0.0.40
codegen_flags: <defaults>
</compile_context>

<pallas_src>
import jax
import jax.numpy as jnp
from jax.experimental import pallas as pl
from jax.experimental.pallas import tpu as pltpu


def _se_kernel(x_ref, w1t_ref, b1_ref, w2t_ref, b2_ref, o_ref):
    # x_ref : (Nb, C, HW) native dtype.  Weights are pre-transposed, pre-cast
    # to f32 and pre-scaled (1/HW folded into w1t) in the wrapper; their
    # index_maps are constant so the blocks stay resident across grid steps
    # and nothing is re-cast per step.
    x = x_ref[...]

    # Squeeze: raw f32-accumulated sum over spatial (mean scale lives in w1t).
    y = jnp.sum(x, axis=-1, dtype=jnp.float32)                      # (Nb, C)

    # Excitation: FC1 (1x1 conv) + ReLU, FC2 (1x1 conv) + sigmoid; both
    # matmuls are lane-dense.
    h = jnp.maximum(
        jnp.dot(y, w1t_ref[...], preferred_element_type=jnp.float32)
        + b1_ref[...], 0.0)                                         # (Nb, Cr)
    s = jax.nn.sigmoid(
        jnp.dot(h, w2t_ref[...], preferred_element_type=jnp.float32)
        + b2_ref[...])                                              # (Nb, C)

    # Excite: channel gate broadcast over spatial.  Deliberate choice: cast the
    # tiny gate to the input dtype and multiply/store in native dtype so the
    # big tensor never materializes in f32.
    o_ref[...] = x * s.astype(o_ref.dtype)[:, :, None]


def _vmem_capacity_bytes():
    try:
        info = pltpu.get_tpu_info()
        cap = getattr(info, "vmem_capacity_bytes", None)
        if cap:
            return int(cap)
    except Exception:
        pass
    return 64 * 1024 * 1024  # conservative default (v7x per-TC VMEM)


def se_block(x, w1, b1, w2, b2):
    """x: (N, C, H, W); w1: (Cr, C); b1: (Cr,); w2: (C, Cr); b2: (C,)."""
    N, C, H, W = x.shape
    Cr = w1.shape[0]
    HW = H * W
    dsize = jnp.dtype(x.dtype).itemsize

    # Free reshape (contiguous); no pad and no final slice.  A non-128-multiple
    # HW just means a slightly masked DMA/store edge, which is far cheaper than
    # two extra full passes over x in HBM.
    x_flat = x.reshape(N, C, HW)
    # TODO(synk): if the surrounding model is channels-last, an (N, HW, C)
    # layout makes the store lane-dense in C and avoids the gate lane-broadcast.

    # Per-generation VMEM budgeting: block budget = 3/8 of capacity (in + out
    # blocks, double-buffered => <= 3/4 of capacity), scoped limit = 3/4.
    vmem_cap = _vmem_capacity_bytes()
    vmem_budget = (3 * vmem_cap) // 8
    per_batch_bytes = 2 * C * HW * dsize              # in block + out block, 1 batch elem

    max_nb = max(1, vmem_budget // (2 * per_batch_bytes))   # x2: double-buffering
    max_nb = min(max_nb, N)
    # Megacore: keep >=4 grid steps (>=2 per TensorCore) when N allows it so
    # each core overlaps prefetch/compute/writeback; >=2 steps otherwise.
    if N >= 4:
        max_nb = min(max_nb, pl.cdiv(N, 4))
    elif N >= 2:
        max_nb = min(max_nb, pl.cdiv(N, 2))
    nb = max(1, max_nb)
    # cdiv grid: partial last block is fine -- every row of the block is
    # computed independently (sum / FCs / gate never mix batch rows), so the
    # out-of-bounds rows produce garbage that is simply discarded on writeback.
    grid = pl.cdiv(N, nb)

    vmem_limit = min(vmem_cap,
                     max((3 * vmem_cap) // 4,
                         2 * per_batch_bytes * nb + (2 << 20)))
    # TODO(synk): if a single batch element (2*C*HW*dsize, double-buffered)
    # ever exceeds VMEM, add a spatial-tiling fallback (two-pass squeeze/excite).

    # One-time layout/scale plumbing: transpose weights, fold 1/HW into FC1,
    # cast everything to f32 once so the kernel never re-casts per step.
    inv_hw = 1.0 / float(HW)
    w1t = (w1.T * inv_hw).astype(jnp.float32)         # (C, Cr)
    w2t = w2.T.astype(jnp.float32)                    # (Cr, C)
    b1r = b1.reshape(1, Cr).astype(jnp.float32)
    b2r = b2.reshape(1, C).astype(jnp.float32)

    cost = pl.CostEstimate(
        flops=int(2 * N * C * HW + 4 * N * C * Cr),
        transcendentals=int(N * C),
        bytes_accessed=int(2 * N * C * HW * dsize),
    )

    out = pl.pallas_call(
        _se_kernel,
        out_shape=jax.ShapeDtypeStruct((N, C, HW), x.dtype),
        grid_spec=pltpu.PrefetchScalarGridSpec(
            num_scalar_prefetch=0,
            grid=(grid,),
            in_specs=[
                pl.BlockSpec((nb, C, HW), lambda n: (n, 0, 0)),
                pl.BlockSpec((C, Cr), lambda n: (0, 0)),
                pl.BlockSpec((1, Cr), lambda n: (0, 0)),
                pl.BlockSpec((Cr, C), lambda n: (0, 0)),
                pl.BlockSpec((1, C), lambda n: (0, 0)),
            ],
            out_specs=pl.BlockSpec((nb, C, HW), lambda n: (n, 0, 0)),
        ),
        compiler_params=pltpu.CompilerParams(
            dimension_semantics=("parallel",),
            vmem_limit_bytes=int(vmem_limit),
        ),
        cost_estimate=cost,
    )(x_flat, w1t, b1r, w2t, b2r)

    return out.reshape(N, C, H, W)


def _reference(x, w1, b1, w2, b2):
    # Pure-JAX reference of the PyTorch forward (nn.Sigmoid, not hard-sigmoid).
    y = jnp.mean(x, axis=(2, 3))                                  # (N, C)
    h = jnp.maximum(y @ w1.T + b1, 0.0)                           # (N, Cr)
    s = jax.nn.sigmoid(h @ w2.T + b2)                             # (N, C)
    return x * s[:, :, None, None]


if __name__ == "__main__":
    key = jax.random.PRNGKey(0)
    N, C, H, W = 2, 8, 16, 16
    reduction = 4
    Cr = C // reduction

    kx, k1, k2, k3, k4 = jax.random.split(key, 5)
    x = jax.random.normal(kx, (N, C, H, W), dtype=jnp.float32)
    # Parameter shapes match nn.Conv2d(k=1) weights with the 1x1 dims squeezed.
    w1 = jax.random.normal(k1, (Cr, C), dtype=jnp.float32) * 0.1
    b1 = jax.random.normal(k2, (Cr,), dtype=jnp.float32) * 0.1
    w2 = jax.random.normal(k3, (C, Cr), dtype=jnp.float32) * 0.1
    b2 = jax.random.normal(k4, (C,), dtype=jnp.float32) * 0.1

    out = se_block(x, w1, b1, w2, b2)
    jax.block_until_ready(out)

    ref = _reference(x, w1, b1, w2, b2)
    assert jnp.allclose(out, ref, atol=1e-5, rtol=1e-5), "mismatch vs reference"

    print("KERNEL_OK")
</pallas_src>

<mosaic_0001>
module attributes {stable_mosaic.version = 11 : i64} {
  func.func @_se_kernel(%arg0: i32, %arg1: memref<1x8x256xf32, #tpu.memory_space<vmem>>, %arg2: memref<8x2xf32, #tpu.memory_space<vmem>>, %arg3: memref<1x2xf32, #tpu.memory_space<vmem>>, %arg4: memref<2x8xf32, #tpu.memory_space<vmem>>, %arg5: memref<1x8xf32, #tpu.memory_space<vmem>>, %arg6: memref<1x8x256xf32, #tpu.memory_space<vmem>>) attributes {dimension_semantics = [#tpu.dimension_semantics<parallel>], iteration_bounds = array<i64: 2>, scalar_prefetch = 0 : i64, scratch_operands = 0 : i64, tpu.core_type = #tpu.core_type<tc>, window_params = [{transform_indices = @transform_0, window_bounds = array<i64: 1, 8, 256>}, {pipeline_mode = #tpu.pipeline_mode<synchronous>, transform_indices = @transform_1, window_bounds = array<i64: 8, 2>}, {pipeline_mode = #tpu.pipeline_mode<synchronous>, transform_indices = @transform_2, window_bounds = array<i64: 1, 2>}, {pipeline_mode = #tpu.pipeline_mode<synchronous>, transform_indices = @transform_3, window_bounds = array<i64: 2, 8>}, {pipeline_mode = #tpu.pipeline_mode<synchronous>, transform_indices = @transform_4, window_bounds = array<i64: 1, 8>}, {transform_indices = @transform_5, window_bounds = array<i64: 1, 8, 256>}]} {
    %c0 = arith.constant 0 : index
    %c0_0 = arith.constant 0 : index
    %c0_1 = arith.constant 0 : index
    %0 = vector.load %arg1[%c0, %c0_0, %c0_1] : memref<1x8x256xf32, #tpu.memory_space<vmem>>, vector<1x8x256xf32>
    %cst = arith.constant dense<0.000000e+00> : vector<1x8xf32>
    %1 = vector.multi_reduction <add>, %0, %cst [2] : vector<1x8x256xf32> to vector<1x8xf32>
    %c0_2 = arith.constant 0 : index
    %c0_3 = arith.constant 0 : index
    %2 = vector.load %arg2[%c0_2, %c0_3] : memref<8x2xf32, #tpu.memory_space<vmem>>, vector<8x2xf32>
    %cst_4 = arith.constant dense<0.000000e+00> : vector<1x2xf32>
    %3 = tpu.matmul %1, %2, %cst_4 {dimension_numbers = #tpu.dot_dimension_numbers<[1], [0], [0], [1], [0, 0, 1, 1], [], []>} : vector<1x8xf32>, vector<8x2xf32>, vector<1x2xf32> -> vector<1x2xf32>
    %c0_5 = arith.constant 0 : index
    %c0_6 = arith.constant 0 : index
    %4 = vector.load %arg3[%c0_5, %c0_6] : memref<1x2xf32, #tpu.memory_space<vmem>>, vector<1x2xf32>
    %5 = arith.addf %3, %4 : vector<1x2xf32>
    %cst_7 = arith.constant 0.000000e+00 : f32
    %6 = vector.broadcast %cst_7 : f32 to vector<1x2xf32>
    %7 = arith.maximumf %5, %6 : vector<1x2xf32>
    %c0_8 = arith.constant 0 : index
    %c0_9 = arith.constant 0 : index
    %8 = vector.load %arg4[%c0_8, %c0_9] : memref<2x8xf32, #tpu.memory_space<vmem>>, vector<2x8xf32>
    %cst_10 = arith.constant dense<0.000000e+00> : vector<1x8xf32>
    %9 = tpu.matmul %7, %8, %cst_10 {dimension_numbers = #tpu.dot_dimension_numbers<[1], [0], [0], [1], [0, 0, 1, 1], [], []>} : vector<1x2xf32>, vector<2x8xf32>, vector<1x8xf32> -> vector<1x8xf32>
    %c0_11 = arith.constant 0 : index
    %c0_12 = arith.constant 0 : index
    %10 = vector.load %arg5[%c0_11, %c0_12] : memref<1x8xf32, #tpu.memory_space<vmem>>, vector<1x8xf32>
    %11 = arith.addf %9, %10 : vector<1x8xf32>
    %12 = arith.negf %11 : vector<1x8xf32>
    %13 = math.exp %12 : vector<1x8xf32>
    %cst_13 = arith.constant 1.000000e+00 : f32
    %14 = vector.broadcast %cst_13 : f32 to vector<1x8xf32>
    %15 = arith.addf %14, %13 : vector<1x8xf32>
    %16 = arith.divf %14, %15 : vector<1x8xf32>
    %17 = vector.shape_cast %16 : vector<1x8xf32> to vector<1x8x1xf32>
    %18 = vector.broadcast %17 : vector<1x8x1xf32> to vector<1x8x256xf32>
    %19 = arith.mulf %0, %18 : vector<1x8x256xf32>
    %c0_14 = arith.constant 0 : index
    %c0_15 = arith.constant 0 : index
    %c0_16 = arith.constant 0 : index
    %20 = vector.load %arg6[%c0_14, %c0_15, %c0_16] : memref<1x8x256xf32, #tpu.memory_space<vmem>>, vector<1x8x256xf32>
    tpu.vector_store %arg6[%c0_14, %c0_15, %c0_16], %19 {strides = array<i32>} : memref<1x8x256xf32, #tpu.memory_space<vmem>>, vector<1x8x256xf32>,
    return
  }
  func.func @transform_0(%arg0: i32) -> (i32, i32, i32) {
    %c0_i32 = arith.constant 0 : i32
    %c0_i32_0 = arith.constant 0 : i32
    %c0_i32_1 = arith.constant 0 : i32
    return %arg0, %c0_i32, %c0_i32_0 : i32, i32, i32
  }
  func.func @transform_1(%arg0: i32) -> (i32, i32) {
    %c0_i32 = arith.constant 0 : i32
    %c0_i32_0 = arith.constant 0 : i32
    %c0_i32_1 = arith.constant 0 : i32
    return %c0_i32, %c0_i32_0 : i32, i32
  }
  func.func @transform_2(%arg0: i32) -> (i32, i32) {
    %c0_i32 = arith.constant 0 : i32
    %c0_i32_0 = arith.constant 0 : i32
    %c0_i32_1 = arith.constant 0 : i32
    return %c0_i32, %c0_i32_0 : i32, i32
  }
  func.func @transform_3(%arg0: i32) -> (i32, i32) {
    %c0_i32 = arith.constant 0 : i32
    %c0_i32_0 = arith.constant 0 : i32
    %c0_i32_1 = arith.constant 0 : i32
    return %c0_i32, %c0_i32_0 : i32, i32
  }
  func.func @transform_4(%arg0: i32) -> (i32, i32) {
    %c0_i32 = arith.constant 0 : i32
    %c0_i32_0 = arith.constant 0 : i32
    %c0_i32_1 = arith.constant 0 : i32
    return %c0_i32, %c0_i32_0 : i32, i32
  }
  func.func @transform_5(%arg0: i32) -> (i32, i32, i32) {
    %c0_i32 = arith.constant 0 : i32
    %c0_i32_0 = arith.constant 0 : i32
    %c0_i32_1 = arith.constant 0 : i32
    return %arg0, %c0_i32, %c0_i32_0 : i32, i32, i32
  }
}

</mosaic_0001>

<bundles_post_ra>
// kernel: tpu_custom_call.1
= control target key start
LH: loop header
LB: loop body
LE: loop exit
PB: predicated region body
PF: predicated region fallthrough
CT: control target
= control target key end

     0   :  { %10 = vsyncpa [#allocation3], 0  ;;  %s767_s0 = inlined_call_operand.hbm [shape: f32[2,8,256], index: 0, kind: input, shape index: {}]   ;;  %s768_s1 = inlined_call_operand.vmem [shape: f32[8,2], index: 1, kind: input, shape index: {}]   ;;  %s769_s2 = inlined_call_operand.vmem [shape: f32[1,2], index: 2, kind: input, shape index: {}]   ;;  %s770_s3 = inlined_call_operand.vmem [shape: f32[2,8], index: 3, kind: input, shape index: {}]   ;;  %s771_s4 = inlined_call_operand.vmem [shape: f32[1,8], index: 4, kind: input, shape index: {}]   ;;  %s772_s5 = inlined_call_operand.hbm [shape: f32[2,8,256], index: 5, kind: output, shape index: {}]  }
   0x1   :  { %12 = vsyncpa [#allocation3 + $0x1], 0 }
   0x2   :  { %13 = vsyncpa [#allocation4], 0 }
   0x3   :  { %15 = vsyncpa [#allocation4 + $0x1], 0  ;;  %s624_s18 = smov 0   ;;  %s626_s19 = smov 0  }
   0x4   :  { %s628_s20 = smov 0   ;;  %s630_s21 = smov 0  }
   0x5 LB: > { %s645_s22 = sadd.s32 4294967295, %s592_s21   ;;  %s425_s23 = sadd.s32 4294967294, %s592_s21   ;;  %s592_s21 = sphi %s630_s21, %s782_s21   ;;  %s588_s20 = sphi %s628_s20, %s781_s20   ;;  %s584_s19 = sphi %s626_s19, %s780_s19   ;;  %s580_s18 = sphi %s624_s18, %s779_s18  }
   0x6   : > { %s649_s24 = sadd.s32 1, %s592_s21   ;;  %s28_s25 = sadd.s32 1, %s588_s20 }
   0x7   : > { %s25_s26 = ssub.s32 %s592_s21, %s649_s24  ;;  %p35_p0 = scmp.ne.s32.totalorder %s588_s20, %s584_s19 }
   0x8   : > { %p26_p1 = scmp.eq.s32.totalorder %s25_s26, 0  ;;  %p36_p2 = scmp.eq.s32.totalorder %s592_s21, 0 }
   0x9   : > { %p41_p3 = scmp.ne.s32.totalorder %s584_s19, %s580_s18  ;;  %p42_p4 = scmp.eq.s32.totalorder %s645_s22, 0 }
   0xa   : > { %s661_s27 = scalar_select %p26_p1, %s588_s20, %s28_s25  }
   0xb   : > { %p663_p5 = por %p36_p2, %p35_p0  ;;  %p667_p6 = por %p42_p4, %p41_p3 }
   0xc   : > { %p149_p7 = scmp.eq.s32.totalorder %s645_s22, 1  ;;  %p155_p8 = scmp.eq.s32.totalorder %s425_s23, 1 }
   0xd   : > { %p457_p10 = scmp.lt.s32.totalorder %s592_s21, 2  ;;  %s187_s7 = sand.u32 1, %s588_s20  }
   0xe   : > { %p674_p11 = por %p149_p7, %p35_p0  ;;  %p678_p12 = por %p155_p8, %p41_p3 }
   0xf   : > { %s443_s8 = sshll.u32 %s592_s21, 4  ;;  %s428_s9 = sshll.u32 %s187_s7, 4 }
  0x10   : > { %s196_s12 = scalar_lea.hbm %s767_s0, %s443_s8  ;;  %s191_s14 = scalar_lea.vmem [#allocation2], %s428_s9 }
  0x11   : > { %s198_s13 = sshll.u32 %s196_s12, 4  ;;  %s200_s15 = sshll.u32 %s191_s14, 4  ;;  %s199_s13 = int_to_ptr.hbm [resolvable:$true] %s198_s13  ;;  %s201_s15 = int_to_ptr.vmem [resolvable:$true] %s200_s15 }
  0x12   : > { %p689_p13 = pnand %p457_p10, %p663_p5  ;;  %p431_p0 = scmp.ge.s32.totalorder %s592_s21, 1 }
  0x13   : > { %p205_p1 = scmp.lt.s32.totalorder %s592_s21, 3  ;;  %s188_s17 = scalar_lea.sflag [#allocation3], %s187_s7 }
  0x14   : > { %s496_s23 = sshra.s32 %s199_s13, 4  ;;  %p500_p3 = pneg %p689_p13  ;;  %s497_s23 = int_to_ptr.hbm [resolvable:$true] %s496_s23 }
  0x15   : > { %s498_s25 = scalar_lea.hbm %s497_s23, 16  ;;  %s503_s28 = scalar_lea.hbm %s767_s0, 32 }
  0x16   : > { %p499_p2 = scmp.ne.s32.totalorder %s497_s23, %s498_s25  ;;  %p504_p5 = scmp.lt.s32.totalorder %s497_s23, %s767_s0 }
  0x17   : > { %p505_p8 = scmp.lt.s32.totalorder %s503_s28, %s498_s25 }
  0x18   : > { %p501_p4 = pnand %p500_p3, %p499_p2 }
  0x19   : > { %p506_p10 = por %p505_p8, %p504_p5 }
  0x1a   : > { %p502_p7 = pneg %p501_p4 }
  0x1c   : > { %p507_p9 = pnand %p506_p10, %p502_p7 }
  0x1e   : > { %510 = shalt.err (!%p507_p9)
}
  0x1f   : > { %452 = dma.hbm_to_vmem [thread:$0]  (!%p689_p13), %s199_s13, 256, %s201_s15, %s188_s17  }
  0x20   : > { %p206_p2 = pnand %p431_p0, %p205_p1 }
  0x21   : > { %s710_s7 = sand.u32 (!%p206_p2), 1, %s584_s19  }
  0x22   : > { %209 = sbr.rel (%p206_p2) target bundleno = 570 (0x23a), region = 40  ;;  %s432_s11 = sshll.u32 (!%p206_p2), %s710_s7, 4 }
  0x23   : > { %s212_s12 = scalar_lea.sflag (!%p206_p2), [#allocation3], %s710_s7  ;;  %s215_s14 = scalar_lea.vmem (!%p206_p2), [#allocation2], %s432_s11 }
  0x27   : > { %571 = dma.done.wait (%p667_p6), %s212_s12, 256  }
  0x28   : > { %573 = vsyncadd (%p667_p6), %s212_s12, 4294967040  ;;  %v243_v0 = vld [vmem:[%s215_s14] sm:$0xff]  ;;  %v244_v1 = vld [vmem:[%s215_s14 + $0x8] sm:$0xff]  ;;  %v251_v4 = vlaneseq  ;;  %vm254_vm0 = vcmask 64512   ;;  %vm284_vm1 = vcmask 1041408   ;;  %vm280_vm2 = vcmask 15360  }
  0x29   : > { %v245_v2 = vadd.f32 %v244_v1, %v243_v0  ;;  %v248_v3 = vld [vmem:[%s768_s1] sm:$0xff]  ;;  %s444_s8 = sshll.u32 %s645_s22, 4  ;;  %s242_s12 = scalar_lea.vmem [#allocation5], %s432_s11 }
  0x2a   : > { %272 = vmatpush.msra.mxu0 %v248_v3  ;;  %v252_v5 = vand.u32 127, %v251_v4  ;;  %v278_v8 = vld [vmem:[%s770_s3] sm:$0x3]  ;;  %v329_v13 = vshrl.u32 %v251_v4, 7  ;;  %s350_s10 = scalar_lea.hbm %s772_s5, %s444_s8  ;;  %s352_s14 = sshll.u32 %s242_s12, 4  ;;  %s353_s14 = int_to_ptr.vmem [resolvable:$true] %s352_s14 }
  0x2b   : > { %246 = vadd.xlane.f32.xlu0 %v245_v2  ;;  %435 = vmatpush.msk.msra.mxu1 %vm284_vm1, %v278_v8  ;;  %v249_v9 = vld [vmem:[%s769_s2] sm:$0x1]  ;;  %s354_s13 = sshll.u32 %s350_s10, 4  ;;  %s339_s15 = scalar_lea.sflag [#allocation4], %s710_s7  ;;  %s355_s13 = int_to_ptr.hbm [resolvable:$true] %s354_s13 }
  0x2c   : > { %491 = vset.pattern.permute.xlu0 %v329_v13  ;;  %v279_v14 = vld [vmem:[%s771_s4] sm:$0x1]  ;;  %s540_s16 = sshra.s32 %s355_s13, 4  ;;  %s546_s11 = scalar_lea.hbm %s772_s5, 32  ;;  %s541_s16 = int_to_ptr.hbm [resolvable:$true] %s540_s16 }
  0x2d   : > { %s542_s22 = scalar_lea.hbm %s541_s16, 16  ;;  %p547_p0 = scmp.lt.s32.totalorder %s541_s16, %s772_s5 }
  0x2e   : > { %p543_p6 = scmp.ne.s32.totalorder %s541_s16, %s542_s22  ;;  %p548_p1 = scmp.lt.s32.totalorder %s546_s11, %s542_s22 }
  0x30   : > { %p544_p9 = pnand %p543_p6, %p674_p11  ;;  %p549_p3 = por %p548_p1, %p547_p0 }
  0x32   : > { %p545_p13 = pneg %p544_p9 }
  0x34   : > { %p550_p4 = pnand %p549_p3, %p545_p13 }
  0x9e   : > { %v247_v6 = vpop.xlane.xlu0 %246 }
  0x9f   : > { %v253_v7 = vperm.slane %v247_v6, %v252_v5 }
  0xa1   : > { %434 = vmatmul.msk.f32.vlgmr.msra.gmra.mxu0 %vm254_vm0, %v253_v7 }
 0x11e   : > { %v274_v10 = vpop.f32.mrf.mxu0 }
 0x11f   : > { %v275_v11 = vadd.f32 %v274_v10, %v249_v9 }
 0x121   : > { %v277_v12 = vmax.f32 %v275_v11, 0.0 }
 0x123   : > { %436 = vmatmul.msk.f32.vlgmr.msra.gmra.mxu1 %vm280_vm2, %v277_v12 }
 0x1a0   : > { %v305_v15 = vpop.f32.mrf.mxu1 }
 0x1a1   : > { %v306_v16 = vadd.f32 %v305_v15, %v279_v14 }
 0x1a3   : > { %v437_v17 = vmul.f32 -1.442695, %v306_v16 }
 0x1a5   : > { %492 = vpow2.f32 %v437_v17 }
 0x1ab   : > { %v493_v18 = vpop.eup %492 }
 0x1ac   : > { %v311_v19 = vadd.f32 1.0, %v493_v18 }
 0x1ae   : > { %494 = vrcp.f32 %v311_v19  ;;  %v323_v23 = vand.u32 2147483648, %v311_v19  ;;  %v321_v25 = vand.u32 2147483647, %v311_v19  ;;  %vm317_vm4 = vweird.f32 %v311_v19 }
 0x1b0   : > { %v324_v27 = vor.u32 1.1754944e-38, %v323_v23  ;;  %vm322_vm6 = vcmp.eq.f32.partialorder %v321_v25, 8.507059e+37 }
 0x1b4   : > { %v495_v20 = vpop.eup %494 }
 0x1b5   : > { %v313_v21 = vmul.f32 %v495_v20, %v311_v19  ;;  %vm318_vm3 = vweird.f32 %v495_v20 }
 0x1b6   : > { %vm319_vm5 = vmor %vm317_vm4, %vm318_vm3 }
 0x1b7   : > { %v314_v22 = vsub.f32 1.0, %v313_v21 }
 0x1b9   : > { %v315_v24 = vmul.f32 %v495_v20, %v314_v22 }
 0x1bb   : > { %v316_v26 = vadd.f32 %v495_v20, %v315_v24 }
 0x1bd   : > { %v320_v28 = vsel %vm319_vm5, %v495_v20, %v316_v26 }
 0x1be   : > { %v325_v29 = vsel %vm322_vm6, %v324_v27, %v320_v28 }
 0x1bf   : > { %v327_v30 = vperm.slane %v325_v29, 0 }
 0x1c1   : > { %332 = vperm.xlu0 %491, %v327_v30  }
 0x233   : > { %v333_v31 = vpop.permute.xlu0 %332 }
 0x234   : > { %v334_v32 = vmul.f32 %v333_v31, %v243_v0  ;;  %v335_v33 = vmul.f32 %v333_v31, %v244_v1 }
 0x236   : > { %336 = vst [vmem:[%s242_s12] sm:$0xff] %v334_v32 }
 0x237   : > { %337 = vst [vmem:[%s242_s12 + $0x8] sm:$0xff] %v335_v33 }
 0x238   : > { %553 = shalt.err (!%p550_p4)
}
 0x239   : > { %447 = dma.vmem_to_hbm [thread:$0]  (%p674_p11), %s353_s14, 256, %s355_s13, %s339_s15  }
 0x23a PF: > { %s366_s7 = sand.u32 1, %s580_s18   ;;  %p778_p7 = scmp.ge.s32.totalorder %s592_s21, 2 }
 0x23b   : > { %s367_s26 = scalar_lea.sflag [#allocation4], %s366_s7 }
 0x23c   : > { %p454_p5 = pnand %p778_p7, %p678_p12 }
 0x23e   : > { %p455_p8 = pneg %p454_p5 }
 0x240   : > { %575 = dma.done.wait (%p455_p8), %s367_s26, 256  }
 0x241   : > { %577 = vsyncadd (%p455_p8), %s367_s26, 4294967040  ;;  %p18_p10 = scmp.ge.s32.totalorder %s649_s24, 4   ;;  %s779_s18 = smov %s584_s19 }
 0x242   : > { %s780_s19 = smov %s588_s20  ;;  %s781_s20 = smov %s661_s27 }
 0x243   : > { %s782_s21 = smov %s649_s24  ;;  %20 = sbr.rel (!%p18_p10) target bundleno = 5 (0x5), region = 85 }
 0x248   :  { %373 = vsyncpa [#allocation3], 1 }
 0x249   :  { %375 = vsyncpa [#allocation3 + $0x1], 1 }
 0x24a   :  { %376 = vsyncpa [#allocation4], 1 }
 0x24b   :  { %378 = vsyncpa [#allocation4 + $0x1], 1 }

</bundles_post_ra>
